<compile_context>
chip_gen: v6e
topology: v6e:2x2x1
jax: 0.10.0
libtpu: 0.0.40
codegen_flags: <defaults>
</compile_context>

<pallas_src>
import functools

import jax
import jax.numpy as jnp
from jax import lax
from jax.experimental import pallas as pl
from jax.experimental.pallas import tpu as pltpu


def _mha_kernel(x_ref, w_in_ref, b_in_ref, wo_ref, bo_ref, out_ref,
                *maybe_attnw_ref, approx_recip):
    """One grid step = `bt` whole batch elements of single-head attention."""
    attnw_ref = maybe_attnw_ref[0] if maybe_attnw_ref else None
    bt, s, e = x_ref.shape
    cdt = x_ref.dtype                       # MXU input dtype (f32 or bf16)

    x2d = x_ref[...].reshape(bt * s, e)

    # ---- in-projection: three lane-aligned dots, f32 accumulation ----------
    # w_in_ref is (3, E, E), pre-transposed wrapper-side; leading-axis indexing
    # is a free view, so there is no `.T` and no lane-misaligned slicing here.
    # The 1/sqrt(E) scale is already folded into w_in_ref[0] / b_in_ref[0].
    q = (jnp.dot(x2d, w_in_ref[0], preferred_element_type=jnp.float32)
         + b_in_ref[0]).reshape(bt, s, e).astype(cdt)
    k = (jnp.dot(x2d, w_in_ref[1], preferred_element_type=jnp.float32)
         + b_in_ref[1]).reshape(bt, s, e).astype(cdt)
    v = (jnp.dot(x2d, w_in_ref[2], preferred_element_type=jnp.float32)
         + b_in_ref[2]).reshape(bt, s, e).astype(cdt)

    # ---- scores: contract the feature axes directly (no k.T copy) ----------
    scores = lax.dot_general(                               # (bt, S, S), f32
        q, k,
        dimension_numbers=(((2,), (2,)), ((0,), (0,))),
        preferred_element_type=jnp.float32)

    # ---- numerically-stable softmax over keys (always f32) -----------------
    m = jnp.max(scores, axis=-1, keepdims=True)
    ex = jnp.exp(scores - m)
    denom = jnp.sum(ex, axis=-1, keepdims=True)
    # One reciprocal per row (EUP slot) + broadcast multiply, not an S×S divide.
    p = ex * pl.reciprocal(denom, approx=approx_recip)      # (bt, S, S)

    # ---- attention * V, then out-projection ---------------------------------
    ctx = lax.dot_general(                                  # (bt, S, E), f32
        p.astype(cdt), v,
        dimension_numbers=(((2,), (1,)), ((0,), (0,))),
        preferred_element_type=jnp.float32)
    out = jnp.dot(ctx.reshape(bt * s, e).astype(cdt), wo_ref[...],
                  preferred_element_type=jnp.float32) + bo_ref[...]

    out_ref[...] = out.reshape(bt, s, e).astype(out_ref.dtype)
    if attnw_ref is not None:
        attnw_ref[...] = p.astype(attnw_ref.dtype)


def _vmem_limit_bytes(block_b, S, E, cdt, out_dt, w_dt, need_weights):
    """Re-derive the scoped VMEM limit from the double-buffered block sizes."""
    c = jnp.dtype(cdt).itemsize
    o = jnp.dtype(out_dt).itemsize
    w = jnp.dtype(w_dt).itemsize
    blocks = 2 * block_b * S * E * (c + o)          # x in + out, double-buffered
    if need_weights:
        blocks += 2 * block_b * S * S * w           # attention weights block
    blocks += 2 * (4 * E * E * c + 4 * E * 4)       # projection weights + biases
    # f32 intermediates live alongside the blocks during compute.
    interm = 4 * block_b * S * E * 4 + 3 * block_b * S * S * 4
    est = blocks + interm
    # Raise the 16/32 MiB scoped defaults, stay under v7x's 64 MiB physical.
    return int(min(56 * 1024 * 1024, max(32 * 1024 * 1024, 2 * est)))


def self_attention_pallas(x, wq, wk, wv, bq, bk, bv, wo, bo, *,
                          block_b=None,
                          compute_dtype=None,
                          need_weights=True,
                          weights_dtype=None,
                          approx_softmax=None):
    """x: (B, S, E). Returns (outputs (B, S, E), weights (S, B, S) or None)."""
    B, S, E = x.shape

    cdt = jnp.dtype(compute_dtype) if compute_dtype is not None else jnp.dtype(x.dtype)
    if not jnp.issubdtype(cdt, jnp.floating):
        raise ValueError(f"compute_dtype must be a float dtype, got {cdt}")
    # Approx reciprocal (EUP) by default only on narrow compute dtypes so the
    # f32 path keeps exactly-normalized rows; override with approx_softmax.
    if approx_softmax is None:
        approx_softmax = bool(jnp.finfo(cdt).bits < 32)

    # bf16 attention-weights writeback by default: halves the dominant
    # O(B*S^2) HBM store volume (softmax itself stays f32).
    w_dt = jnp.dtype(weights_dtype) if weights_dtype is not None else jnp.dtype(jnp.bfloat16)

    if block_b is None:
        if B == 1:
            block_b = 1
        else:
            # >= 2 grid steps: lets the BlockSpec pipeline overlap DMA with
            # compute and keeps both v7x TensorCores busy.
            cap = B // 2
            block_b = max(d for d in range(1, cap + 1) if B % d == 0)
    if B % block_b != 0:
        raise ValueError("block_b must divide the batch size")

    # ---- free wrapper-side layout plumbing ----------------------------------
    scale = float(E) ** -0.5
    # Fold 1/sqrt(E) into the Q projection; stack pre-transposed weights so the
    # kernel's leading-axis indexing is a free, lane-aligned view.
    w_in = jnp.stack([wq.T * scale, wk.T, wv.T]).astype(cdt)          # (3, E, E)
    b_in = jnp.stack([bq * scale, bk, bv]).reshape(3, 1, E).astype(jnp.float32)
    wo_t = wo.T.astype(cdt)                                           # (E, E)
    bo_r = bo.reshape(1, E).astype(jnp.float32)
    x_c = x.astype(cdt)

    out_shapes = [jax.ShapeDtypeStruct((B, S, E), x.dtype)]
    out_specs = [pl.BlockSpec((block_b, S, E), lambda b: (b, 0, 0))]
    if need_weights:
        out_shapes.append(jax.ShapeDtypeStruct((B, S, S), w_dt))
        out_specs.append(pl.BlockSpec((block_b, S, S), lambda b: (b, 0, 0)))

    vmem_limit = _vmem_limit_bytes(block_b, S, E, cdt, x.dtype, w_dt, need_weights)

    results = pl.pallas_call(
        functools.partial(_mha_kernel, approx_recip=approx_softmax),
        out_shape=out_shapes,
        grid_spec=pltpu.PrefetchScalarGridSpec(
            num_scalar_prefetch=0,
            grid=(B // block_b,),
            in_specs=[
                pl.BlockSpec((block_b, S, E), lambda b: (b, 0, 0)),   # x
                pl.BlockSpec((3, E, E), lambda b: (0, 0, 0)),         # stacked W^T
                pl.BlockSpec((3, 1, E), lambda b: (0, 0, 0)),         # stacked bias
                pl.BlockSpec((E, E), lambda b: (0, 0)),               # Wo^T
                pl.BlockSpec((1, E), lambda b: (0, 0)),               # bo
            ],
            out_specs=out_specs,
        ),
        compiler_params=pltpu.CompilerParams(
            dimension_semantics=("parallel",),
            vmem_limit_bytes=vmem_limit),
    )(x_c, w_in, b_in, wo_t, bo_r)

    out = results[0]
    if not need_weights:
        return out, None

    # nn.MultiheadAttention returns weights as (B, S, S); the module transposes
    # to (S, B, S).  This batch-major -> seq-major relayout stays wrapper-side:
    # Mosaic's in-kernel transpose only supports minor-dim swaps, so emitting
    # the (S, block_b, S) block directly from the kernel is not reliably
    # lowerable.  The bf16 default halves this extra traffic.
    weights = jnp.transpose(results[1], (1, 0, 2))
    return out, weights


def self_attention_ref(x, wq, wk, wv, bq, bk, bv, wo, bo):
    """Pure-JAX reference mirroring nn.MultiheadAttention(num_heads=1)."""
    E = x.shape[-1]
    q = x @ wq.T + bq
    k = x @ wk.T + bk
    v = x @ wv.T + bv
    scores = (q / jnp.sqrt(jnp.float32(E))) @ jnp.swapaxes(k, -1, -2)
    p = jax.nn.softmax(scores, axis=-1)
    out = (p @ v) @ wo.T + bo
    return out, jnp.transpose(p, (1, 0, 2))


if __name__ == "__main__":
    B, S, E = 2, 8, 32   # batch, seq, hidden_dim

    key = jax.random.PRNGKey(0)
    keys = jax.random.split(key, 8)

    x = jax.random.normal(keys[0], (B, S, E), dtype=jnp.float32)

    # Deterministic synthetic parameters (shapes from nn.MultiheadAttention(E, 1)):
    #   in_proj_weight (3E, E) split into Wq/Wk/Wv; in_proj_bias (3E,);
    #   out_proj weight (E, E), bias (E,)
    scale = 1.0 / jnp.sqrt(jnp.float32(E))
    wq = jax.random.normal(keys[1], (E, E), dtype=jnp.float32) * scale
    wk = jax.random.normal(keys[2], (E, E), dtype=jnp.float32) * scale
    wv = jax.random.normal(keys[3], (E, E), dtype=jnp.float32) * scale
    bq = jax.random.normal(keys[4], (E,), dtype=jnp.float32) * 0.1
    bk = jax.random.normal(keys[5], (E,), dtype=jnp.float32) * 0.1
    bv = jax.random.normal(keys[6], (E,), dtype=jnp.float32) * 0.1
    wo = jax.random.normal(keys[7], (E, E), dtype=jnp.float32) * scale
    bo = jnp.zeros((E,), dtype=jnp.float32)

    out_ref_, weights_ref_ = self_attention_ref(x, wq, wk, wv, bq, bk, bv, wo, bo)

    # --- 1) f32 path, exact f32 weights, default block_b (>= 2 grid steps) ---
    out, weights = self_attention_pallas(
        x, wq, wk, wv, bq, bk, bv, wo, bo, weights_dtype=jnp.float32)
    out = jax.block_until_ready(out)
    weights = jax.block_until_ready(weights)
    assert out.shape == (B, S, E)
    assert weights.shape == (S, B, S)
    assert jnp.allclose(out, out_ref_, atol=1e-4, rtol=1e-4)
    assert jnp.allclose(weights, weights_ref_, atol=1e-4, rtol=1e-4)

    # --- 2) bf16 MXU-input path with bf16 weights writeback (default),
    #        single whole-batch block --------------------------------------
    out_bf, w_bf = self_attention_pallas(
        x, wq, wk, wv, bq, bk, bv, wo, bo,
        compute_dtype=jnp.bfloat16, block_b=B)
    out_bf = jax.block_until_ready(out_bf)
    w_bf = jax.block_until_ready(w_bf)
    assert out_bf.shape == (B, S, E) and w_bf.shape == (S, B, S)
    assert jnp.allclose(out_bf.astype(jnp.float32), out_ref_, atol=0.15, rtol=0.15)
    assert jnp.allclose(w_bf.astype(jnp.float32), weights_ref_, atol=0.05, rtol=0.1)

    # --- 3) need_weights=False: skip the O(B*S^2) weights writeback ----------
    out_nw, w_nw = self_attention_pallas(
        x, wq, wk, wv, bq, bk, bv, wo, bo, need_weights=False)
    out_nw = jax.block_until_ready(out_nw)
    assert w_nw is None
    assert jnp.allclose(out_nw, out_ref_, atol=1e-4, rtol=1e-4)

    print("KERNEL_OK")
</pallas_src>

<mosaic_0001>
module attributes {stable_mosaic.version = 11 : i64} {
  func.func @_mha_kernel(%arg0: i32, %arg1: memref<1x8x32xf32, #tpu.memory_space<vmem>>, %arg2: memref<3x32x32xf32, #tpu.memory_space<vmem>>, %arg3: memref<3x1x32xf32, #tpu.memory_space<vmem>>, %arg4: memref<32x32xf32, #tpu.memory_space<vmem>>, %arg5: memref<1x32xf32, #tpu.memory_space<vmem>>, %arg6: memref<1x8x32xf32, #tpu.memory_space<vmem>>, %arg7: memref<1x8x8xf32, #tpu.memory_space<vmem>>) attributes {dimension_semantics = [#tpu.dimension_semantics<parallel>], iteration_bounds = array<i64: 2>, scalar_prefetch = 0 : i64, scratch_operands = 0 : i64, tpu.core_type = #tpu.core_type<tc>, window_params = [{transform_indices = @transform_0, window_bounds = array<i64: 1, 8, 32>}, {pipeline_mode = #tpu.pipeline_mode<synchronous>, transform_indices = @transform_1, window_bounds = array<i64: 3, 32, 32>}, {pipeline_mode = #tpu.pipeline_mode<synchronous>, transform_indices = @transform_2, window_bounds = array<i64: 3, 1, 32>}, {pipeline_mode = #tpu.pipeline_mode<synchronous>, transform_indices = @transform_3, window_bounds = array<i64: 32, 32>}, {pipeline_mode = #tpu.pipeline_mode<synchronous>, transform_indices = @transform_4, window_bounds = array<i64: 1, 32>}, {transform_indices = @transform_5, window_bounds = array<i64: 1, 8, 32>}, {transform_indices = @transform_6, window_bounds = array<i64: 1, 8, 8>}]} {
    %c0 = arith.constant 0 : index
    %c0_0 = arith.constant 0 : index
    %c0_1 = arith.constant 0 : index
    %0 = vector.load %arg1[%c0, %c0_0, %c0_1] : memref<1x8x32xf32, #tpu.memory_space<vmem>>, vector<1x8x32xf32>
    %1 = vector.shape_cast %0 : vector<1x8x32xf32> to vector<8x32xf32>
    %c0_2 = arith.constant 0 : index
    %c0_3 = arith.constant 0 : index
    %c0_4 = arith.constant 0 : index
    %2 = vector.load %arg2[%c0_2, %c0_3, %c0_4] : memref<3x32x32xf32, #tpu.memory_space<vmem>>, vector<1x32x32xf32>
    %3 = vector.shape_cast %2 : vector<1x32x32xf32> to vector<32x32xf32>
    %cst = arith.constant dense<0.000000e+00> : vector<8x32xf32>
    %4 = tpu.matmul %1, %3, %cst {dimension_numbers = #tpu.dot_dimension_numbers<[1], [0], [0], [1], [0, 0, 1, 1], [], []>} : vector<8x32xf32>, vector<32x32xf32>, vector<8x32xf32> -> vector<8x32xf32>
    %c0_5 = arith.constant 0 : index
    %c0_6 = arith.constant 0 : index
    %c0_7 = arith.constant 0 : index
    %5 = vector.load %arg3[%c0_5, %c0_6, %c0_7] : memref<3x1x32xf32, #tpu.memory_space<vmem>>, vector<1x1x32xf32>
    %6 = vector.shape_cast %5 : vector<1x1x32xf32> to vector<1x32xf32>
    %7 = vector.broadcast %6 : vector<1x32xf32> to vector<8x32xf32>
    %8 = arith.addf %4, %7 : vector<8x32xf32>
    %9 = vector.shape_cast %8 : vector<8x32xf32> to vector<1x8x32xf32>
    %c1 = arith.constant 1 : index
    %c0_8 = arith.constant 0 : index
    %c0_9 = arith.constant 0 : index
    %10 = vector.load %arg2[%c1, %c0_8, %c0_9] : memref<3x32x32xf32, #tpu.memory_space<vmem>>, vector<1x32x32xf32>
    %11 = vector.shape_cast %10 : vector<1x32x32xf32> to vector<32x32xf32>
    %cst_10 = arith.constant dense<0.000000e+00> : vector<8x32xf32>
    %12 = tpu.matmul %1, %11, %cst_10 {dimension_numbers = #tpu.dot_dimension_numbers<[1], [0], [0], [1], [0, 0, 1, 1], [], []>} : vector<8x32xf32>, vector<32x32xf32>, vector<8x32xf32> -> vector<8x32xf32>
    %c1_11 = arith.constant 1 : index
    %c0_12 = arith.constant 0 : index
    %c0_13 = arith.constant 0 : index
    %13 = vector.load %arg3[%c1_11, %c0_12, %c0_13] : memref<3x1x32xf32, #tpu.memory_space<vmem>>, vector<1x1x32xf32>
    %14 = vector.shape_cast %13 : vector<1x1x32xf32> to vector<1x32xf32>
    %15 = vector.broadcast %14 : vector<1x32xf32> to vector<8x32xf32>
    %16 = arith.addf %12, %15 : vector<8x32xf32>
    %17 = vector.shape_cast %16 : vector<8x32xf32> to vector<1x8x32xf32>
    %c2 = arith.constant 2 : index
    %c0_14 = arith.constant 0 : index
    %c0_15 = arith.constant 0 : index
    %18 = vector.load %arg2[%c2, %c0_14, %c0_15] : memref<3x32x32xf32, #tpu.memory_space<vmem>>, vector<1x32x32xf32>
    %19 = vector.shape_cast %18 : vector<1x32x32xf32> to vector<32x32xf32>
    %cst_16 = arith.constant dense<0.000000e+00> : vector<8x32xf32>
    %20 = tpu.matmul %1, %19, %cst_16 {dimension_numbers = #tpu.dot_dimension_numbers<[1], [0], [0], [1], [0, 0, 1, 1], [], []>} : vector<8x32xf32>, vector<32x32xf32>, vector<8x32xf32> -> vector<8x32xf32>
    %c2_17 = arith.constant 2 : index
    %c0_18 = arith.constant 0 : index
    %c0_19 = arith.constant 0 : index
    %21 = vector.load %arg3[%c2_17, %c0_18, %c0_19] : memref<3x1x32xf32, #tpu.memory_space<vmem>>, vector<1x1x32xf32>
    %22 = vector.shape_cast %21 : vector<1x1x32xf32> to vector<1x32xf32>
    %23 = vector.broadcast %22 : vector<1x32xf32> to vector<8x32xf32>
    %24 = arith.addf %20, %23 : vector<8x32xf32>
    %25 = vector.shape_cast %24 : vector<8x32xf32> to vector<1x8x32xf32>
    %cst_20 = arith.constant dense<0.000000e+00> : vector<1x8x8xf32>
    %26 = tpu.matmul %9, %17, %cst_20 {dimension_numbers = #tpu.dot_dimension_numbers<[2], [2], [1], [1], [0, 0, 0, 1, 1, 1], [0], [0]>} : vector<1x8x32xf32>, vector<1x8x32xf32>, vector<1x8x8xf32> -> vector<1x8x8xf32>
    %cst_21 = arith.constant dense<0xFF800000> : vector<1x8xf32>
    %27 = vector.multi_reduction <maximumf>, %26, %cst_21 [2] : vector<1x8x8xf32> to vector<1x8xf32>
    %28 = vector.shape_cast %27 : vector<1x8xf32> to vector<1x8x1xf32>
    %29 = vector.broadcast %28 : vector<1x8x1xf32> to vector<1x8x8xf32>
    %30 = arith.subf %26, %29 : vector<1x8x8xf32>
    %31 = math.exp %30 : vector<1x8x8xf32>
    %cst_22 = arith.constant dense<0.000000e+00> : vector<1x8xf32>
    %32 = vector.multi_reduction <add>, %31, %cst_22 [2] : vector<1x8x8xf32> to vector<1x8xf32>
    %33 = vector.shape_cast %32 : vector<1x8xf32> to vector<1x8x1xf32>
    %34 = tpu.reciprocal %33 : vector<1x8x1xf32> -> vector<1x8x1xf32>
    %35 = vector.broadcast %34 : vector<1x8x1xf32> to vector<1x8x8xf32>
    %36 = arith.mulf %31, %35 : vector<1x8x8xf32>
    %cst_23 = arith.constant dense<0.000000e+00> : vector<1x8x32xf32>
    %37 = tpu.matmul %36, %25, %cst_23 {dimension_numbers = #tpu.dot_dimension_numbers<[2], [1], [1], [2], [0, 0, 0, 1, 1, 2], [0], [0]>} : vector<1x8x8xf32>, vector<1x8x32xf32>, vector<1x8x32xf32> -> vector<1x8x32xf32>
    %38 = vector.shape_cast %37 : vector<1x8x32xf32> to vector<8x32xf32>
    %c0_24 = arith.constant 0 : index
    %c0_25 = arith.constant 0 : index
    %39 = vector.load %arg4[%c0_24, %c0_25] : memref<32x32xf32, #tpu.memory_space<vmem>>, vector<32x32xf32>
    %cst_26 = arith.constant dense<0.000000e+00> : vector<8x32xf32>
    %40 = tpu.matmul %38, %39, %cst_26 {dimension_numbers = #tpu.dot_dimension_numbers<[1], [0], [0], [1], [0, 0, 1, 1], [], []>} : vector<8x32xf32>, vector<32x32xf32>, vector<8x32xf32> -> vector<8x32xf32>
    %c0_27 = arith.constant 0 : index
    %c0_28 = arith.constant 0 : index
    %41 = vector.load %arg5[%c0_27, %c0_28] : memref<1x32xf32, #tpu.memory_space<vmem>>, vector<1x32xf32>
    %42 = vector.broadcast %41 : vector<1x32xf32> to vector<8x32xf32>
    %43 = arith.addf %40, %42 : vector<8x32xf32>
    %44 = vector.shape_cast %43 : vector<8x32xf32> to vector<1x8x32xf32>
    %c0_29 = arith.constant 0 : index
    %c0_30 = arith.constant 0 : index
    %c0_31 = arith.constant 0 : index
    %45 = vector.load %arg6[%c0_29, %c0_30, %c0_31] : memref<1x8x32xf32, #tpu.memory_space<vmem>>, vector<1x8x32xf32>
    tpu.vector_store %arg6[%c0_29, %c0_30, %c0_31], %44 {strides = array<i32>} : memref<1x8x32xf32, #tpu.memory_space<vmem>>, vector<1x8x32xf32>,
    %c0_32 = arith.constant 0 : index
    %c0_33 = arith.constant 0 : index
    %c0_34 = arith.constant 0 : index
    %46 = vector.load %arg7[%c0_32, %c0_33, %c0_34] : memref<1x8x8xf32, #tpu.memory_space<vmem>>, vector<1x8x8xf32>
    tpu.vector_store %arg7[%c0_32, %c0_33, %c0_34], %36 {strides = array<i32>} : memref<1x8x8xf32, #tpu.memory_space<vmem>>, vector<1x8x8xf32>,
    return
  }
  func.func @transform_0(%arg0: i32) -> (i32, i32, i32) {
    %c0_i32 = arith.constant 0 : i32
    %c0_i32_0 = arith.constant 0 : i32
    %c0_i32_1 = arith.constant 0 : i32
    return %arg0, %c0_i32, %c0_i32_0 : i32, i32, i32
  }
  func.func @transform_1(%arg0: i32) -> (i32, i32, i32) {
    %c0_i32 = arith.constant 0 : i32
    %c0_i32_0 = arith.constant 0 : i32
    %c0_i32_1 = arith.constant 0 : i32
    %c0_i32_2 = arith.constant 0 : i32
    return %c0_i32, %c0_i32_0, %c0_i32_1 : i32, i32, i32
  }
  func.func @transform_2(%arg0: i32) -> (i32, i32, i32) {
    %c0_i32 = arith.constant 0 : i32
    %c0_i32_0 = arith.constant 0 : i32
    %c0_i32_1 = arith.constant 0 : i32
    %c0_i32_2 = arith.constant 0 : i32
    return %c0_i32, %c0_i32_0, %c0_i32_1 : i32, i32, i32
  }
  func.func @transform_3(%arg0: i32) -> (i32, i32) {
    %c0_i32 = arith.constant 0 : i32
    %c0_i32_0 = arith.constant 0 : i32
    %c0_i32_1 = arith.constant 0 : i32
    return %c0_i32, %c0_i32_0 : i32, i32
  }
  func.func @transform_4(%arg0: i32) -> (i32, i32) {
    %c0_i32 = arith.constant 0 : i32
    %c0_i32_0 = arith.constant 0 : i32
    %c0_i32_1 = arith.constant 0 : i32
    return %c0_i32, %c0_i32_0 : i32, i32
  }
  func.func @transform_5(%arg0: i32) -> (i32, i32, i32) {
    %c0_i32 = arith.constant 0 : i32
    %c0_i32_0 = arith.constant 0 : i32
    %c0_i32_1 = arith.constant 0 : i32
    return %arg0, %c0_i32, %c0_i32_0 : i32, i32, i32
  }
  func.func @transform_6(%arg0: i32) -> (i32, i32, i32) {
    %c0_i32 = arith.constant 0 : i32
    %c0_i32_0 = arith.constant 0 : i32
    %c0_i32_1 = arith.constant 0 : i32
    return %arg0, %c0_i32, %c0_i32_0 : i32, i32, i32
  }
}

</mosaic_0001>

<bundles_post_ra>
// kernel: tpu_custom_call.1
= control target key start
LH: loop header
LB: loop body
LE: loop exit
PB: predicated region body
PF: predicated region fallthrough
CT: control target
= control target key end

     0   :  { %s1622_s0 = inlined_call_operand.hbm [shape: f32[2,8,32], index: 0, kind: input, shape index: {}]   ;;  %s1623_s1 = inlined_call_operand.hbm [shape: f32[3,32,32], index: 1, kind: input, shape index: {}]   ;;  %s1624_s2 = inlined_call_operand.vmem [shape: f32[3,1,32], index: 2, kind: input, shape index: {}]   ;;  %s1625_s3 = inlined_call_operand.hbm [shape: f32[32,32], index: 3, kind: input, shape index: {}]   ;;  %s1626_s4 = inlined_call_operand.vmem [shape: f32[1,32], index: 4, kind: input, shape index: {}]   ;;  %s1627_s5 = inlined_call_operand.hbm [shape: f32[2,8,32], index: 5, kind: output, shape index: {0}]   ;;  %s1628_s6 = inlined_call_operand.hbm [shape: f32[2,8,8], index: 6, kind: output, shape index: {1}]  }
   0x1   :  { %1633 = sst [smem:[#allocation15_spill]] %s1623_s1 }
   0x2   :  { %12 = vsyncpa [#allocation3], 0 }
   0x3   :  { %14 = vsyncpa [#allocation3 + $0x1], 0 }
   0x4   :  { %15 = vsyncpa [#allocation6], 0 }
   0x5   :  { %16 = vsyncpa [#allocation4], 0 }
   0x6   :  { %18 = vsyncpa [#allocation4 + $0x1], 0 }
   0x7   :  { %19 = vsyncpa [#allocation10], 0 }
   0x8   :  { %21 = vsyncpa [#allocation10 + $0x1], 0  ;;  %s1373_s21 = smov 0   ;;  %s1375_s22 = smov 0  }
   0x9   :  { %s1377_s23 = smov 0   ;;  %s1379_s24 = smov 0  }
   0xa LB: > { %s1394_s25 = sadd.s32 4294967295, %s1327_s24   ;;  %s959_s26 = sadd.s32 4294967294, %s1327_s24   ;;  %s1327_s24 = sphi %s1379_s24, %s1652_s24   ;;  %s1323_s23 = sphi %s1377_s23, %s1651_s23   ;;  %s1319_s22 = sphi %s1375_s22, %s1650_s22   ;;  %s1315_s21 = sphi %s1373_s21, %s1649_s21  }
   0xb   : > { %p47_p0 = scmp.ne.s32.totalorder %s1319_s22, %s1315_s21  ;;  %p1629_p1 = scmp.eq.s32.totalorder %s1394_s25, 0 }
   0xc   : > { %p161_p3 = scmp.eq.s32.totalorder %s959_s26, 1  ;;  %p960_p5 = scmp.ge.s32.totalorder %s1327_s24, 1 }
   0xd   : > { %p1403_p4 = por %p1629_p1, %p47_p0  ;;  %p194_p7 = scmp.lt.s32.totalorder %s1327_s24, 3 }
   0xe   : > { %p1408_p6 = por %p161_p3, %p47_p0  ;;  %s1329_s30 = smov [#allocation5]  }
   0xf   : > { %s1634_s27 = scalar_select %p1403_p4, 1, 0 }
  0x10   : > { %s1635_s28 = scalar_select %p1408_p6, 1, 0 }
  0x11   : > { %p1413_p8 = pnand %p960_p5, %p194_p7  ;;  %s206_s7 = sshll.u32 %s1329_s30, 4  ;;  %s207_s7 = int_to_ptr.vmem [resolvable:$true] %s206_s7 }
  0x12   : > { %s1330_s9 = smov [#allocation7]   ;;  %s1160_s11 = scalar_lea.vmem %s207_s7, 1536 }
  0x13   : > { %s1636_s29 = scalar_select %p1413_p8, 1, 0 }
  0x14   : > { %p1083_p9 = pneg %p1413_p8  ;;  %s222_s10 = sshll.u32 %s1330_s9, 4  ;;  %s223_s10 = int_to_ptr.vmem [resolvable:$true] %s222_s10 }
  0x15   : > { %p1161_p13 = scmp.ne.s32.totalorder %s207_s7, %s1160_s11  ;;  %p1168_p5 = scmp.lt.s32.totalorder %s207_s7, %s207_s7 }
  0x16   : > { %p1422_p11 = pnand %p1083_p9, %p1629_p1  ;;  %p1169_p7 = scmp.lt.s32.totalorder %s1160_s11, %s1160_s11 }
  0x18   : > { %p1151_p12 = pneg %p1422_p11  ;;  %p1170_p10 = por %p1169_p7, %p1168_p5 }
  0x1a   : > { %p1163_p0 = pnand %p1161_p13, %p1151_p12 }
  0x1c   : > { %p1164_p3 = pneg %p1163_p0 }
  0x1e   : > { %p1171_p9 = pnand %p1170_p10, %p1164_p3 }
  0x20   : > { %1174 = shalt.err (!%p1171_p9)
}
  0x21   : > { %s1331_s12 = smov 128   ;;  %s1332_s13 = smov 8  }
  0x22   : > { %s1638_s1 = sld [smem:[#allocation15_spill]]  ;;  %s1186_s16 = scalar_lea.vmem %s223_s10, 512 }
  0x23   : > { %p1187_p1 = scmp.ne.s32.totalorder %s223_s10, %s1186_s16  ;;  %p1194_p2 = scmp.lt.s32.totalorder %s223_s10, %s223_s10 }
  0x24   : > { %p1195_p6 = scmp.lt.s32.totalorder %s1186_s16, %s1186_s16 }
  0x25   : > { %p1189_p13 = pnand %p1187_p1, %p1151_p12 }
  0x26   : > { %p1196_p5 = por %p1195_p6, %p1194_p2 }
  0x27   : > { %p1190_p0 = pneg %p1189_p13 }
  0x28   : > { %1086 = dma.hbm_to_vmem [thread:$0]  (!%p1422_p11), %s1638_s1, 1536, %s207_s7, [#allocation6], %s1331_s12, %s1331_s12, %s1332_s13  }
  0x29   : > { %p1197_p10 = pnand %p1196_p5, %p1190_p0 }
  0x2b   : > { %1200 = shalt.err (!%p1197_p10)
}
  0x2c   : > { %1089 = dma.hbm_to_vmem [thread:$0]  (!%p1422_p11), %s1625_s3, 512, %s223_s10, [#allocation6], %s1331_s12, %s1331_s12, %s1332_s13  }
  0x2d   : > { %s1445_s19 = sadd.s32 1, %s1327_s24   ;;  %s34_s20 = sadd.s32 1, %s1323_s23 }
  0x2e   : > { %s31_s26 = ssub.s32 %s1327_s24, %s1445_s19  ;;  %p41_p1 = scmp.ne.s32.totalorder %s1323_s23, %s1319_s22 }
  0x2f   : > { %p32_p2 = scmp.eq.s32.totalorder %s31_s26, 0  ;;  %p42_p6 = scmp.eq.s32.totalorder %s1327_s24, 0 }
  0x30   : > { %p1639_p12 = scmp.eq.s32.totalorder %s1394_s25, 1  ;;  %p1103_p7 = scmp.lt.s32.totalorder %s1327_s24, 2 }
  0x31   : > { %s1461_s7 = scalar_select %p32_p2, %s1323_s23, %s34_s20  }
  0x32   : > { %p1455_p3 = por %p1639_p12, %p41_p1  ;;  %p43_p9 = por %p42_p6, %p41_p1 }
  0x33   : > { %s239_s8 = sand.u32 1, %s1323_s23   ;;  %s965_s10 = sshll.u32 %s1327_s24, 7 }
  0x34   : > { %s1640_s30 = scalar_select %p1455_p3, 1, 0 }
  0x35   : > { %s964_s9 = sshll.u32 %s239_s8, 3  ;;  %s1468_s13 = scalar_lea.hbm %s1622_s0, %s965_s10 }
  0x36   : > { %s243_s14 = scalar_lea.vmem [#allocation2], %s964_s9  ;;  %p1470_p11 = pnand %p1103_p7, %p43_p9 }
  0x37   : > { %s250_s15 = sshll.u32 %s243_s14, 4  ;;  %s240_s17 = scalar_lea.sflag [#allocation3], %s239_s8  ;;  %s251_s15 = int_to_ptr.vmem [resolvable:$true] %s250_s15 }
  0x38   : > { %s1201_s18 = scalar_lea.hbm %s1468_s13, 128  ;;  %p1203_p0 = pneg %p1470_p11 }
  0x39   : > { %p1202_p13 = scmp.ne.s32.totalorder %s1468_s13, %s1201_s18  ;;  %s1206_s10 = scalar_lea.hbm %s1622_s0, 256 }
  0x3a   : > { %p1207_p1 = scmp.lt.s32.totalorder %s1468_s13, %s1622_s0  ;;  %p1208_p2 = scmp.lt.s32.totalorder %s1206_s10, %s1201_s18 }
  0x3b   : > { %p1204_p5 = pnand %p1203_p0, %p1202_p13 }
  0x3c   : > { %p1209_p6 = por %p1208_p2, %p1207_p1 }
  0x3d   : > { %p1205_p10 = pneg %p1204_p5 }
  0x3f   : > { %p1210_p12 = pnand %p1209_p6, %p1205_p10 }
  0x41   : > { %1213 = shalt.err (!%p1210_p12)
}
  0x42   : > { %s1214_s12 = scalar_lea.vmem %s251_s15, 128  ;;  %s1333_s8 = smov [#allocation2]  }
  0x43   : > { %p1215_p7 = scmp.ne.s32.totalorder %s251_s15, %s1214_s12  ;;  %s1219_s14 = sshll.u32 %s1333_s8, 4  ;;  %s1220_s14 = int_to_ptr.vmem [resolvable:$false] %s1219_s14 }
  0x44   : > { %s1221_s1 = scalar_lea.vmem %s1220_s14, 256  ;;  %p1222_p13 = scmp.lt.s32.totalorder %s251_s15, %s1220_s14 }
  0x45   : > { %p1217_p9 = pnand %p1215_p7, %p1203_p0  ;;  %p1223_p5 = scmp.lt.s32.totalorder %s1221_s1, %s1214_s12 }
  0x47   : > { %p1218_p3 = pneg %p1217_p9  ;;  %p1224_p4 = por %p1223_p5, %p1222_p13 }
  0x49   : > { %p1225_p8 = pnand %p1224_p4, %p1218_p3 }
  0x4b   : > { %1228 = shalt.err (!%p1225_p8)
}
  0x4c   : > { %1093 = dma.hbm_to_vmem [thread:$0]  (!%p1470_p11), %s1468_s13, 128, %s251_s15, %s240_s17  }
  0x4d   : > { %p1642_p10 = scmp.ne.s32.totalorder %s1636_s29, 0 }
  0x4e   : > { %s1491_s18 = sand.u32 (!%p1642_p10), 1, %s1319_s22   ;;  %p1643_p4 = scmp.ne.s32.totalorder (!%p1642_p10), %s1634_s27, 0 }
  0x4f   : > { %259 = sbr.rel (%p1642_p10) target bundleno = 1202 (0x4b2), region = 40  ;;  %s1494_s20 = sshll.u32 (!%p1642_p10), %s1491_s18, 3 }
  0x50   : > { %s262_s1 = scalar_lea.sflag (!%p1642_p10), [#allocation3], %s1491_s18  ;;  %s265_s26 = scalar_lea.vmem (!%p1642_p10), [#allocation2], %s1494_s20 }
  0x54   : > { %1298 = dma.done.wait (%p1643_p4), %s262_s1, 128  }
  0x55   : > { %1300 = vsyncadd (%p1643_p4), %s262_s1, 4294967168  ;;  %p1644_p8 = scmp.eq.s32.totalorder %s1394_s25, 0 }
  0x57   : > { %1302 = dma.done.wait (%p1644_p8), [#allocation6], 2048   ;;  %p1645_p3 = pmov %p1644_p8 }
  0x58   : > { %v1334_v0 = vmov 0.0   ;;  %vm1335_vm0 = vmmov 0   ;;  %v397_v1 = vld [vmem:[#allocation5 + $0x38] sm:$0xff]  ;;  %v396_v3 = vld [vmem:[#allocation5 + $0x30] sm:$0xff]  ;;  %v395_v5 = vld [vmem:[#allocation5 + $0x28] sm:$0xff]  ;;  %vm319_vm1 = vcmask 261120  }
  0x59   : > { %1304 = vsyncadd (%p1645_p3), [#allocation6], 4294965248  ;;  %1026 = vmatprep.subr.mxu1 %v1334_v0  ;;  %1015 = vmatprep.subr.mxu0 %v1334_v0  ;;  %v311_v2 = vld [vmem:[#allocation5 + $0x18] sm:$0xff]  ;;  %v310_v4 = vld [vmem:[#allocation5 + $0x10] sm:$0xff]  ;;  %vm635_vm2 = vcmask 64512   ;;  %s306_s10 = scalar_lea.vmem [#allocation9], %s1494_s20 }
  0x5a   : > { %1034 = vmatprep.mubr.msk.f32.mxu1 %vm1335_vm0, %v1334_v0  ;;  %1023 = vmatprep.mubr.msk.f32.mxu0 %vm1335_vm0, %v1334_v0  ;;  %v309_v6 = vld [vmem:[#allocation5 + $0x8] sm:$0xff]  ;;  %v394_v7 = vld [vmem:[#allocation5 + $0x20] sm:$0xff]  ;;  %v307_v9 = vld [vmem:[%s265_s26] sm:$0xff]  ;;  %s987_s11 = sshll.u32 %s1394_s25, 7  ;;  %s838_s14 = sshll.u32 %s306_s10, 4  ;;  %s839_s14 = int_to_ptr.vmem [resolvable:$true] %s838_s14 }
  0x5b   : > { %1027 = vmatpush3.msra.mxu1 %v397_v1  ;;  %1016 = vmatpush3.msra.mxu0 %v311_v2  ;;  %v308_v8 = vld [vmem:[#allocation5] sm:$0xff]  ;;  %v975_v10 = vld [vmem:[%s1624_s2 + $0x1] ss:$0 sm:$0xff]  ;;  %v972_v11 = vld [vmem:[%s1624_s2] ss:$0 sm:$0xff]  ;;  %s836_s8 = scalar_lea.hbm %s1628_s6, %s987_s11  ;;  %s812_s1 = scalar_lea.sflag [#allocation10], %s1491_s18 }
  0x5c   : > { %1028 = vmatprep.subr.mxu1 %v1334_v0  ;;  %1017 = vmatprep.subr.mxu0 %v1334_v0  ;;  %v480_v18 = vld [vmem:[#allocation5 + $0x58] sm:$0xff]  ;;  %v479_v19 = vld [vmem:[#allocation5 + $0x50] sm:$0xff]  ;;  %v478_v20 = vld [vmem:[#allocation5 + $0x48] sm:$0xff]  ;;  %s1229_s26 = scalar_lea.vmem %s839_s14, 128  ;;  %p1646_p0 = scmp.ne.s32.totalorder %s1640_s30, 0 }
  0x5d   : > { %1029 = vmatpush3.msra.mxu1 %v396_v3  ;;  %1018 = vmatpush3.msra.mxu0 %v310_v4  ;;  %v477_v21 = vld [vmem:[#allocation5 + $0x40] sm:$0xff]  ;;  %v978_v30 = vld [vmem:[%s1624_s2 + $0x2] ss:$0 sm:$0xff]  ;;  %v723_v34 = vld [vmem:[#allocation7 + $0x18] sm:$0xff]  ;;  %p1230_p11 = scmp.ne.s32.totalorder %s839_s14, %s1229_s26  ;;  %s1336_s27 = smov [#allocation9]  }
  0x5e   : > { %1030 = vmatprep.subr.mxu1 %v1334_v0  ;;  %1019 = vmatprep.subr.mxu0 %v1334_v0  ;;  %v722_v35 = vld [vmem:[#allocation7 + $0x10] sm:$0xff]  ;;  %v721_v36 = vld [vmem:[#allocation7 + $0x8] sm:$0xff]  ;;  %v720_v40 = vld [vmem:[#allocation7] sm:$0xff]  ;;  %s1233_s29 = sshll.u32 %s1336_s27, 4  ;;  %s1234_s29 = int_to_ptr.vmem [resolvable:$false] %s1233_s29 }
  0x5f   : > { %1031 = vmatpush3.msra.mxu1 %v395_v5  ;;  %1020 = vmatpush3.msra.mxu0 %v309_v6  ;;  %p1231_p1 = pnand %p1230_p11, %p1646_p0  ;;  %s1235_s13 = scalar_lea.vmem %s1234_s29, 256 }
  0x60   : > { %1032 = vmatprep.subr.mxu1 %v1334_v0  ;;  %1021 = vmatprep.subr.mxu0 %v1334_v0  ;;  %p1236_p6 = scmp.lt.s32.totalorder %s839_s14, %s1234_s29  ;;  %p1237_p12 = scmp.lt.s32.totalorder %s1235_s13, %s1229_s26 }
  0x61   : > { %1033 = vmatpush3.msra.mxu1 %v394_v7  ;;  %1022 = vmatpush3.msra.mxu0 %v308_v8  ;;  %p1232_p2 = pneg %p1231_p1 }
  0x62   : > { %1035 = vmatmul.mubr.msk.f32.vlgmr.msra.gmra.mxu1 %vm319_vm1, %v307_v9  ;;  %1024 = vmatmul.mubr.msk.f32.vlgmr.msra.gmra.mxu0 %vm319_vm1, %v307_v9  ;;  %p1238_p7 = por %p1237_p12, %p1236_p6 }
  0x63   : > { %1048 = vmatprep.subr.mxu1 %v1334_v0  ;;  %1050 = vmatprep.mubr.msk.f32.mxu1 %vm1335_vm0, %v1334_v0 }
  0x64   : > { %1037 = vmatprep.subr.mxu0 %v1334_v0  ;;  %1045 = vmatprep.mubr.msk.f32.mxu0 %vm1335_vm0, %v1334_v0  ;;  %p1239_p9 = pnand %p1238_p7, %p1232_p2 }
  0x65   : > { %1038 = vmatpush3.msra.mxu0 %v480_v18 }
  0x66   : > { %1039 = vmatprep.subr.mxu0 %v1334_v0 }
  0x67   : > { %1040 = vmatpush3.msra.mxu0 %v479_v19 }
  0x68   : > { %1041 = vmatprep.subr.mxu0 %v1334_v0 }
  0x69   : > { %1042 = vmatpush3.msra.mxu0 %v478_v20 }
  0x6a   : > { %1043 = vmatprep.subr.mxu0 %v1334_v0 }
  0x6b   : > { %1044 = vmatpush3.msra.mxu0 %v477_v21 }
  0x6c   : > { %1046 = vmatmul.mubr.msk.f32.vlgmr.msra.gmra.mxu0 %vm319_vm1, %v307_v9  ;;  %1058 = vmatprep.subr.mxu0 %v1334_v0 }
  0x6d   : > { %1066 = vmatprep.mubr.msk.f32.mxu0 %vm1335_vm0, %v1334_v0  ;;  %1059 = vmatpush3.msra.mxu0 %v723_v34 }
  0x6e   : > { %1060 = vmatprep.subr.mxu0 %v1334_v0 }
  0x6f   : > { %1061 = vmatpush3.msra.mxu0 %v722_v35 }
  0x70   : > { %1062 = vmatprep.subr.mxu0 %v1334_v0 }
  0x71   : > { %1063 = vmatpush3.msra.mxu0 %v721_v36 }
  0x72   : > { %1064 = vmatprep.subr.mxu0 %v1334_v0 }
  0x73   : > { %1065 = vmatpush3.msra.mxu0 %v720_v40 }
 0x122   : > { %v472_v12 = vpop.f32.mrf.mxu1  ;;  %v389_v13 = vpop.f32.mrf.mxu0 }
 0x123   : > { %v473_v14 = vadd.f32 %v975_v10, %v472_v12  ;;  %v390_v15 = vadd.f32 %v972_v11, %v389_v13 }
 0x124   : > { %v1036_v16 = vpop.f32.mrf.mxu1  ;;  %v1025_v17 = vpop.f32.mrf.mxu0 }
 0x125   : > { %1049 = vmatpush3.xpose.msk.msra.mxu1 %vm319_vm1, %v473_v14 }
 0x126   : > { %1053 = vmatprep.subr.mxu1 %v1334_v0 }
 0x128   : > { %1051 = vmatmul.mubr.msk.f32.vlgmr.msra.gmra.mxu1 %vm319_vm1, %v390_v15 }
 0x129   : > { %1055 = vmatprep.mubr.msk.f32.mxu1 %vm1335_vm0, %v1334_v0 }
 0x12c   : > { %v555_v31 = vpop.f32.mrf.mxu0 }
 0x12d   : > { %v556_v32 = vadd.f32 %v978_v30, %v555_v31 }
 0x12e   : > { %v1047_v33 = vpop.f32.mrf.mxu0 }
 0x12f   : > { %1054 = vmatpush3.msra.mxu1 %v556_v32 }
 0x1e8   : > { %v631_v22 = vpop.f32.mrf.mxu1 }
 0x1e9   : > { %v636_v23 = vsel %vm635_vm2, %v631_v22, -inf }
 0x1ea   : > { %637 = vmax.xlane.f32.xlu0 %v636_v23  ;;  %v1052_v24 = vpop.f32.mrf.mxu1 }
 0x273   : > { %v638_v25 = vpop.xlane.xlu0 %637 }
 0x274   : > { %v639_v26 = vsub.f32 %v631_v22, %v638_v25 }
 0x276   : > { %v640_v27 = vmul.f32 1.442695, %v639_v26 }
 0x278   : > { %1145 = vpow2.f32 %v640_v27 }
 0x285   : > { %v1146_v28 = vpop.eup %1145 }
 0x286   : > { %v642_v29 = vsel %vm635_vm2, %v1146_v28, 0.0 }
 0x287   : > { %643 = vadd.xlane.f32.xlu0 %v642_v29 }
 0x310   : > { %v644_v37 = vpop.xlane.xlu0 %643 }
 0x311   : > { %1147 = vrcp.f32 %v644_v37 }
 0x31e   : > { %v1148_v38 = vpop.eup %1147 }
 0x31f   : > { %v646_v39 = vmul.f32 %v1148_v38, %v1146_v28 }
 0x321   : > { %1056 = vmatmul.mubr.msk.f32.vlgmr.msra.gmra.mxu1 %vm635_vm2, %v646_v39  ;;  %805 = vst.msk [vmem:[%s306_s10] sm:$0xff] %vm635_vm2, %v646_v39 }
 0x3e1   : > { %v716_v41 = vpop.f32.mrf.mxu1 }
 0x3e2   : > { %1067 = vmatmul.mubr.msk.f32.vlgmr.msra.gmra.mxu0 %vm319_vm1, %v716_v41 }
 0x3e3   : > { %v1057_v42 = vpop.f32.mrf.mxu1 }
 0x3e4   : > { %1242 = shalt.err (!%p1239_p9)
}
 0x3e5   : > { %s1243_s15 = scalar_lea.hbm %s836_s8, 128  ;;  %s1247_s10 = scalar_lea.hbm %s1628_s6, 256 }
 0x3e6   : > { %p1244_p13 = scmp.ne.s32.totalorder %s836_s8, %s1243_s15  ;;  %p1248_p4 = scmp.lt.s32.totalorder %s836_s8, %s1628_s6 }
 0x3e7   : > { %p1249_p8 = scmp.lt.s32.totalorder %s1247_s10, %s1243_s15 }
 0x3e8   : > { %p1245_p5 = pnand %p1244_p13, %p1646_p0 }
 0x3e9   : > { %p1250_p3 = por %p1249_p8, %p1248_p4 }
 0x3ea   : > { %p1246_p10 = pneg %p1245_p5 }
 0x3ec   : > { %p1251_p11 = pnand %p1250_p3, %p1246_p10 }
 0x3ee   : > { %1254 = shalt.err (!%p1251_p11)
}
 0x3ef   : > { %1080 = dma.vmem_to_hbm [thread:$0]  (%p1646_p0), %s839_s14, 128, %s836_s8, %s812_s1   ;;  %v983_v43 = vld [vmem:[%s1626_s4] ss:$0 sm:$0xff] }
 0x3f0   : > { %s299_s29 = scalar_lea.vmem [#allocation8], %s1494_s20  ;;  %s1584_s17 = scalar_lea.hbm %s1627_s5, %s987_s11 }
 0x3f1   : > { %s825_s13 = sshll.u32 %s299_s29, 4  ;;  %s807_s10 = scalar_lea.sflag [#allocation4], %s1491_s18  ;;  %s826_s13 = int_to_ptr.vmem [resolvable:$true] %s825_s13 }
 0x3f2   : > { %s1255_s8 = scalar_lea.vmem %s826_s13, 128  ;;  %s1337_s20 = smov [#allocation8]  }
 0x3f3   : > { %p1256_p1 = scmp.ne.s32.totalorder %s826_s13, %s1255_s8  ;;  %s1259_s14 = sshll.u32 %s1337_s20, 4  ;;  %s1260_s14 = int_to_ptr.vmem [resolvable:$false] %s1259_s14 }
 0x3f4   : > { %s1261_s1 = scalar_lea.vmem %s1260_s14, 256  ;;  %p1262_p12 = scmp.lt.s32.totalorder %s826_s13, %s1260_s14 }
 0x3f5   : > { %p1257_p2 = pnand %p1256_p1, %p1646_p0  ;;  %p1263_p7 = scmp.lt.s32.totalorder %s1261_s1, %s1255_s8 }
 0x3f7   : > { %p1258_p6 = pneg %p1257_p2  ;;  %p1264_p9 = por %p1263_p7, %p1262_p12 }
 0x3f9   : > { %p1265_p13 = pnand %p1264_p9, %p1258_p6 }
 0x4a2   : > { %v800_v44 = vpop.f32.mrf.mxu0 }
 0x4a3   : > { %v801_v45 = vadd.f32 %v983_v43, %v800_v44 }
 0x4a4   : > { %v1068_v46 = vpop.f32.mrf.mxu0 }
 0x4a5   : > { %804 = vst.msk [vmem:[%s299_s29] sm:$0xff] %vm319_vm1, %v801_v45 }
 0x4a6   : > { %1268 = shalt.err (!%p1265_p13)
}
 0x4a7   : > { %s1269_s25 = scalar_lea.hbm %s1584_s17, 128  ;;  %s1273_s9 = scalar_lea.hbm %s1627_s5, 256 }
 0x4a8   : > { %p1270_p5 = scmp.ne.s32.totalorder %s1584_s17, %s1269_s25  ;;  %p1274_p8 = scmp.lt.s32.totalorder %s1584_s17, %s1627_s5 }
 0x4a9   : > { %p1275_p3 = scmp.lt.s32.totalorder %s1273_s9, %s1269_s25 }
 0x4aa   : > { %p1271_p10 = pnand %p1270_p5, %p1646_p0 }
 0x4ab   : > { %p1276_p11 = por %p1275_p3, %p1274_p8 }
 0x4ac   : > { %p1272_p4 = pneg %p1271_p10 }
 0x4ae   : > { %p1277_p1 = pnand %p1276_p11, %p1272_p4 }
 0x4b0   : > { %1280 = shalt.err (!%p1277_p1)
}
 0x4b1   : > { %1079 = dma.vmem_to_hbm [thread:$0]  (%p1646_p0), %s826_s13, 128, %s1584_s17, %s807_s10  }
 0x4b2 PF: > { %s850_s27 = sand.u32 1, %s1315_s21   ;;  %p1647_p2 = scmp.ne.s32.totalorder %s1635_s28, 0 }
 0x4b3   : > { %p1648_p6 = scmp.ge.s32.totalorder %s1327_s24, 2  ;;  %s851_s29 = scalar_lea.sflag [#allocation4], %s850_s27 }
 0x4b5   : > { %p1095_p12 = pnand %p1648_p6, %p1647_p2 }
 0x4b7   : > { %p1096_p7 = pneg %p1095_p12 }
 0x4b9   : > { %1306 = dma.done.wait (%p1096_p7), %s851_s29, 128  }
 0x4ba   : > { %1308 = vsyncadd (%p1096_p7), %s851_s29, 4294967168  ;;  %s860_s15 = scalar_lea.sflag [#allocation10], %s850_s27 }
 0x4bb   : > { %1310 = dma.done.wait (%p1096_p7), %s860_s15, 128  }
 0x4bc   : > { %1312 = vsyncadd (%p1096_p7), %s860_s15, 4294967168  ;;  %p24_p0 = scmp.ge.s32.totalorder %s1445_s19, 4   ;;  %s1649_s21 = smov %s1319_s22 }
 0x4bd   : > { %s1650_s22 = smov %s1323_s23  ;;  %s1651_s23 = smov %s1461_s7 }
 0x4be   : > { %s1652_s24 = smov %s1445_s19  ;;  %26 = sbr.rel (!%p24_p0) target bundleno = 10 (0xa), region = 114 }
 0x4c3   :  { %865 = vsyncpa [#allocation3], 1 }
 0x4c4   :  { %867 = vsyncpa [#allocation3 + $0x1], 1 }
 0x4c5   :  { %868 = vsyncpa [#allocation6], 1 }
 0x4c6   :  { %869 = vsyncpa [#allocation4], 1 }
 0x4c7   :  { %871 = vsyncpa [#allocation4 + $0x1], 1 }
 0x4c8   :  { %872 = vsyncpa [#allocation10], 1 }
 0x4c9   :  { %874 = vsyncpa [#allocation10 + $0x1], 1 }

</bundles_post_ra>
